<compile_context>
chip_gen: v5e
topology: v5e:2x2
jax: 0.10.0
libtpu: 0.0.40
codegen_flags: <defaults>
</compile_context>

<pallas_src>
import functools
import math

import jax
import jax.numpy as jnp
from jax import lax
from jax.experimental import pallas as pl
from jax.experimental.pallas import tpu as pltpu


def _budget():
    """Returns (per-direction block byte target, scoped-VMEM limit).

    Footprint per step ~= 4 * block_bytes (double-buffered in + out) plus
    ~2 f32-sized in-kernel temps (x.astype(f32), x*x).  The pairs below keep
    that comfortably under the limit on every generation:
      v5e/v6e (128 MiB physical): 6 MiB block -> <=48 MiB, limit 64 MiB
      v7x      (64 MiB physical): 4 MiB block -> <=32 MiB, limit 40 MiB
    """
    try:
        vmem = pltpu.get_tpu_info().vmem_capacity_bytes
    except Exception:
        vmem = None
    if vmem is not None and vmem >= 100 * 1024 * 1024:
        return 6 * 1024 * 1024, 64 * 1024 * 1024
    return 4 * 1024 * 1024, 40 * 1024 * 1024


# ---------------------------------------------------------------------------
# Kernels
# ---------------------------------------------------------------------------
def _pixelnorm_c_kernel(x_ref, o_ref, *, eps):
    """Reduce over axis 1 (channels).

    Works for both block layouts:
      (1, C, TS, 128): dense (sublane, lane) vregs; C-reduce = VPU adds.
      (1, C, TL)     : lane-dense fallback when L is not a 128-multiple.
    Padded rows of a ragged last tile compute garbage on stale VMEM, but the
    writeback is clipped so valid outputs are unaffected.
    """
    x = x_ref[...].astype(jnp.float32)
    ms = jnp.mean(x * x, axis=1, keepdims=True)
    o_ref[...] = (x * lax.rsqrt(ms + eps)).astype(o_ref.dtype)


def _pixelnorm_last_kernel(x_ref, o_ref, *, eps):
    """Block (TM, C): reduce over the last (lane) axis."""
    x = x_ref[...].astype(jnp.float32)
    ms = jnp.mean(x * x, axis=-1, keepdims=True)
    o_ref[...] = (x * lax.rsqrt(ms + eps)).astype(o_ref.dtype)


# ---------------------------------------------------------------------------
# Wrappers
# ---------------------------------------------------------------------------
def _pixelnorm_channels(x3, eps):
    """x3: [B, C, L]; normalizes over axis 1 (C)."""
    B, C, L = x3.shape
    itemsize = jnp.dtype(x3.dtype).itemsize
    block_bytes, vmem_limit = _budget()
    n_elems = max(1, block_bytes // itemsize)        # dtype-aware element budget
    sub = 8 * max(1, 4 // itemsize)                  # dense-vreg sublane multiple

    params = pltpu.CompilerParams(
        dimension_semantics=("parallel", "parallel"),
        vmem_limit_bytes=vmem_limit,
    )
    kernel = functools.partial(_pixelnorm_c_kernel, eps=eps)

    # Prefer the 4-D layout (dense vregs even for tiny C) whenever L splits
    # into full 128-lane rows and the minimum legal tile fits the budget.
    use_4d = (L % 128 == 0) and (C * sub * 128 * itemsize <= block_bytes)

    if use_4d:
        R = L // 128                                  # rows of 128 lanes
        ts = max(1, n_elems // (C * 128))
        if ts >= R:
            ts = R                                    # full extent: always legal
        else:
            ts = min(R, max(sub, (ts // sub) * sub))  # multiple of 8, dense vregs
        # Keep >=2 grid steps when possible so both v7x TensorCores get work.
        if B * pl.cdiv(R, ts) < 2 and R >= 16:
            ts = max(8, (((R + 1) // 2) // 8) * 8)
        x4 = x3.reshape(B, C, R, 128)                 # free, contiguous view
        out = pl.pallas_call(
            kernel,
            out_shape=jax.ShapeDtypeStruct((B, C, R, 128), x3.dtype),
            grid_spec=pltpu.PrefetchScalarGridSpec(
                num_scalar_prefetch=0,
                grid=(B, pl.cdiv(R, ts)),
                in_specs=[pl.BlockSpec((1, C, ts, 128), lambda b, j: (b, 0, j, 0))],
                out_specs=pl.BlockSpec((1, C, ts, 128), lambda b, j: (b, 0, j, 0)),
            ),
            compiler_params=params,
        )(x4)
        return out.reshape(B, C, L)

    # Fallback: lane-dense (1, C, TL) tiles.  Minimum TL is one lane group
    # (128) rather than the whole L, so huge-C inputs never request a block
    # that blows past the VMEM limit.
    tl = max(1, n_elems // max(1, C))
    if tl >= L:
        tl = L
    else:
        tl = min(L, max(128, (tl // 128) * 128))
    if B * pl.cdiv(L, tl) < 2 and L >= 256:
        tl = max(128, (((L + 1) // 2) // 128) * 128)
    return pl.pallas_call(
        kernel,
        out_shape=jax.ShapeDtypeStruct((B, C, L), x3.dtype),
        grid_spec=pltpu.PrefetchScalarGridSpec(
            num_scalar_prefetch=0,
            grid=(B, pl.cdiv(L, tl)),
            in_specs=[pl.BlockSpec((1, C, tl), lambda b, j: (b, 0, j))],
            out_specs=pl.BlockSpec((1, C, tl), lambda b, j: (b, 0, j)),
        ),
        compiler_params=params,
    )(x3)


def _pixelnorm_last(x2, eps):
    """x2: [M, C]; normalizes over the last axis (used when dim is last).

    Note: when C < 128 the output store is a masked vst.msk on a narrow lane
    axis; acceptable because such inputs (mapping-net latents) are tiny, and
    typical z_dim (256/512) is fully lane-dense.
    """
    M, C = x2.shape
    itemsize = jnp.dtype(x2.dtype).itemsize
    block_bytes, vmem_limit = _budget()
    n_elems = max(1, block_bytes // itemsize)
    sub = 8 * max(1, 4 // itemsize)

    tm = max(1, n_elems // max(1, C))
    if tm >= M:
        tm = M
    else:
        tm = min(M, max(sub, (tm // sub) * sub))
    if pl.cdiv(M, tm) < 2 and M >= 16:                # feed both v7x cores
        tm = max(8, (((M + 1) // 2) // 8) * 8)

    return pl.pallas_call(
        functools.partial(_pixelnorm_last_kernel, eps=eps),
        out_shape=jax.ShapeDtypeStruct((M, C), x2.dtype),
        grid_spec=pltpu.PrefetchScalarGridSpec(
            num_scalar_prefetch=0,
            grid=(pl.cdiv(M, tm),),
            in_specs=[pl.BlockSpec((tm, C), lambda i: (i, 0))],
            out_specs=pl.BlockSpec((tm, C), lambda i: (i, 0)),
        ),
        compiler_params=pltpu.CompilerParams(
            dimension_semantics=("parallel",),
            vmem_limit_bytes=vmem_limit,
        ),
    )(x2)


def pixel_norm(x, dim=1, eps=1e-8):
    """PixelNormLayer.forward: x * rsqrt(mean(x^2, dim, keepdim=True) + eps)."""
    ndim = x.ndim
    dim = dim % ndim
    shape = x.shape
    lead = math.prod(shape[:dim])                     # 1 if dim == 0
    C = shape[dim]
    trail = math.prod(shape[dim + 1:])                # 1 if dim is last

    if trail == 1:
        # Reduction axis is (effectively) the last axis: [M, C] lane reduction.
        y = _pixelnorm_last(x.reshape(lead, C), eps)
    else:
        # NCHW dim=1 etc.: free contiguous reshape, reduce over C in-kernel.
        y = _pixelnorm_channels(x.reshape(lead, C, trail), eps)
    return y.reshape(shape)


def pixel_norm_ref(x, dim=1, eps=1e-8):
    ms = jnp.mean(jnp.square(x.astype(jnp.float32)), axis=dim, keepdims=True)
    return (x.astype(jnp.float32) * lax.rsqrt(ms + eps)).astype(x.dtype)


if __name__ == "__main__":
    eps = 1e-8

    # pi-GAN usage: NCHW feature map, channel-wise pixel norm (dim=1).
    B, C, H, W = 2, 4, 16, 16
    x = jax.random.normal(jax.random.PRNGKey(0), (B, C, H, W), dtype=jnp.float32)
    out = jax.block_until_ready(pixel_norm(x, dim=1, eps=eps))
    ref = pixel_norm_ref(x, dim=1, eps=eps)
    assert out.shape == x.shape and out.dtype == x.dtype
    assert jnp.allclose(out, ref, atol=1e-5, rtol=1e-5)

    # Mapping-network style 2-D input (reduction over the last axis).
    x2 = jax.random.normal(jax.random.PRNGKey(1), (8, 32), dtype=jnp.float32)
    out2 = jax.block_until_ready(pixel_norm(x2, dim=1, eps=eps))
    ref2 = pixel_norm_ref(x2, dim=1, eps=eps)
    assert out2.shape == x2.shape and out2.dtype == x2.dtype
    assert jnp.allclose(out2, ref2, atol=1e-5, rtol=1e-5)

    # Ragged spatial extent (L not a multiple of 128) exercises the fallback.
    x3 = jax.random.normal(jax.random.PRNGKey(2), (2, 4, 10, 10), dtype=jnp.float32)
    out3 = jax.block_until_ready(pixel_norm(x3, dim=1, eps=eps))
    ref3 = pixel_norm_ref(x3, dim=1, eps=eps)
    assert out3.shape == x3.shape and out3.dtype == x3.dtype
    assert jnp.allclose(out3, ref3, atol=1e-5, rtol=1e-5)

    print("KERNEL_OK")
</pallas_src>

<mosaic_0001>
module attributes {stable_mosaic.version = 11 : i64} {
  func.func @_pixelnorm_c_kernel(%arg0: i32, %arg1: i32, %arg2: memref<1x4x2x128xf32, #tpu.memory_space<vmem>>, %arg3: memref<1x4x2x128xf32, #tpu.memory_space<vmem>>) attributes {dimension_semantics = [#tpu.dimension_semantics<parallel>, #tpu.dimension_semantics<parallel>], iteration_bounds = array<i64: 2, 1>, scalar_prefetch = 0 : i64, scratch_operands = 0 : i64, tpu.core_type = #tpu.core_type<tc>, window_params = [{transform_indices = @transform_0, window_bounds = array<i64: 1, 4, 2, 128>}, {transform_indices = @transform_1, window_bounds = array<i64: 1, 4, 2, 128>}]} {
    %c0 = arith.constant 0 : index
    %c0_0 = arith.constant 0 : index
    %c0_1 = arith.constant 0 : index
    %c0_2 = arith.constant 0 : index
    %0 = vector.load %arg2[%c0, %c0_0, %c0_1, %c0_2] : memref<1x4x2x128xf32, #tpu.memory_space<vmem>>, vector<1x4x2x128xf32>
    %1 = arith.mulf %0, %0 : vector<1x4x2x128xf32>
    %cst = arith.constant dense<0.000000e+00> : vector<1x2x128xf32>
    %2 = vector.multi_reduction <add>, %1, %cst [1] : vector<1x4x2x128xf32> to vector<1x2x128xf32>
    %3 = vector.shape_cast %2 : vector<1x2x128xf32> to vector<1x1x2x128xf32>
    %cst_3 = arith.constant 4.000000e+00 : f32
    %4 = vector.broadcast %cst_3 : f32 to vector<1x1x2x128xf32>
    %5 = arith.divf %3, %4 : vector<1x1x2x128xf32>
    %cst_4 = arith.constant 9.99999993E-9 : f32
    %6 = vector.broadcast %cst_4 : f32 to vector<1x1x2x128xf32>
    %7 = arith.addf %5, %6 : vector<1x1x2x128xf32>
    %8 = math.rsqrt %7 : vector<1x1x2x128xf32>
    %9 = vector.broadcast %8 : vector<1x1x2x128xf32> to vector<1x4x2x128xf32>
    %10 = arith.mulf %0, %9 : vector<1x4x2x128xf32>
    %c0_5 = arith.constant 0 : index
    %c0_6 = arith.constant 0 : index
    %c0_7 = arith.constant 0 : index
    %c0_8 = arith.constant 0 : index
    %11 = vector.load %arg3[%c0_5, %c0_6, %c0_7, %c0_8] : memref<1x4x2x128xf32, #tpu.memory_space<vmem>>, vector<1x4x2x128xf32>
    tpu.vector_store %arg3[%c0_5, %c0_6, %c0_7, %c0_8], %10 {strides = array<i32>} : memref<1x4x2x128xf32, #tpu.memory_space<vmem>>, vector<1x4x2x128xf32>,
    return
  }
  func.func @transform_0(%arg0: i32, %arg1: i32) -> (i32, i32, i32, i32) {
    %c0_i32 = arith.constant 0 : i32
    %c0_i32_0 = arith.constant 0 : i32
    %c0_i32_1 = arith.constant 0 : i32
    return %arg0, %c0_i32, %arg1, %c0_i32_0 : i32, i32, i32, i32
  }
  func.func @transform_1(%arg0: i32, %arg1: i32) -> (i32, i32, i32, i32) {
    %c0_i32 = arith.constant 0 : i32
    %c0_i32_0 = arith.constant 0 : i32
    %c0_i32_1 = arith.constant 0 : i32
    return %arg0, %c0_i32, %arg1, %c0_i32_0 : i32, i32, i32, i32
  }
}

</mosaic_0001>

<bundles_post_ra>
// kernel: tpu_custom_call.1
= control target key start
LH: loop header
LB: loop body
LE: loop exit
PB: predicated region body
PF: predicated region fallthrough
CT: control target
= control target key end

     0   :  { %6 = vsyncpa [#allocation3], 0  ;;  %s644_s0 = inlined_call_operand.hbm [shape: f32[2,4,2,128], index: 0, kind: input, shape index: {}]   ;;  %s645_s1 = inlined_call_operand.hbm [shape: f32[2,4,2,128], index: 1, kind: output, shape index: {}]  }
   0x1   :  { %8 = vsyncpa [#allocation3 + $0x1], 0 }
   0x2   :  { %9 = vsyncpa [#allocation4], 0 }
   0x3   :  { %11 = vsyncpa [#allocation4 + $0x1], 0  ;;  %s516_s6 = smov 0   ;;  %s518_s7 = smov 0  }
   0x4   :  { %s520_s8 = smov 0   ;;  %s522_s9 = smov 0  }
   0x5   :  { %s524_s10 = smov 0   ;;  %s526_s11 = smov 0  }
   0x6 LB: > { %s299_s12 = sadd.s32 4294967295, %s499_s11   ;;  %s300_s13 = sadd.s32 4294967294, %s499_s11   ;;  %s499_s11 = sphi %s526_s11, %s17_s11   ;;  %s495_s10 = sphi %s524_s10, %s654_s10   ;;  %s491_s9 = sphi %s522_s9, %s653_s9   ;;  %s487_s8 = sphi %s520_s8, %s652_s8   ;;  %s483_s7 = sphi %s518_s7, %s651_s7   ;;  %s479_s6 = sphi %s516_s6, %s650_s6  }
   0x7   : > { %s29_s14 = sadd.s32 1, %s495_s10  ;;  %s38_s15 = sadd.s32 1, %s487_s8 }
   0x8   : > { %p31_p0 = scmp.ge.s32.totalorder %s29_s14, 2  ;;  %p45_p1 = scmp.ne.s32.totalorder %s487_s8, %s483_s7 }
   0x9   : > { %p46_p2 = scmp.eq.s32.totalorder %s499_s11, 0  ;;  %p51_p3 = scmp.ne.s32.totalorder %s483_s7, %s479_s6 }
   0xa   : > { %s656_s14 = smov (%p31_p0, %s29_s14), 0  ;;  %p52_p5 = scmp.eq.s32.totalorder %s299_s12, 0 }
   0xb   : > { %p557_p4 = por %p46_p2, %p45_p1  ;;  %s33_s17 = ssub.s32 %s495_s10, %s656_s14 }
   0xc   : > { %p77_p6 = scmp.eq.s32.totalorder %s299_s12, 1  ;;  %p36_p7 = scmp.eq.s32.totalorder %s33_s17, 0 }
   0xd   : > { %p563_p8 = por %p52_p5, %p51_p3  ;;  %p83_p10 = scmp.eq.s32.totalorder %s300_s13, 1 }
   0xe   : > { %p567_p9 = por %p77_p6, %p45_p1  ;;  %p302_p12 = scmp.ge.s32.totalorder %s499_s11, 2 }
   0xf   : > { %s572_s20 = scalar_select %p36_p7, %s487_s8, %s38_s15  }
  0x10   : > { %p574_p11 = por %p83_p10, %p51_p3  ;;  %p328_p13 = scmp.lt.s32.totalorder %s499_s11, 2 }
  0x11   : > { %s103_s22 = sand.u32 1, %s487_s8   ;;  %s314_s24 = sshll.u32 %s495_s10, 3 }
  0x12   : > { %s303_s23 = sshll.u32 %s103_s22, 3  ;;  %s113_s27 = scalar_lea.hbm %s644_s0, %s314_s24 }
  0x13   : > { %s107_s28 = scalar_lea.vmem [#allocation2], %s303_s23  ;;  %s114_s30 = sshll.u32 %s113_s27, 4  ;;  %s115_s30 = int_to_ptr.hbm [resolvable:$true] %s114_s30 }
  0x14   : > { %s116_s29 = sshll.u32 %s107_s28, 4  ;;  %p321_p0 = pnand %p328_p13, %p557_p4  ;;  %s117_s29 = int_to_ptr.vmem [resolvable:$true] %s116_s29 }
  0x15   : > { %p306_p1 = scmp.ge.s32.totalorder %s499_s11, 1  ;;  %s104_s2 = scalar_lea.sflag [#allocation3], %s103_s22 }
  0x16   : > { %s501_s3 = smov 32   ;;  %s502_s4 = smov 2  }
  0x17   : > { %323 = dma.hbm_to_vmem [thread:$0]  (!%p321_p0), %s115_s30, 128, %s117_s29, %s104_s2, %s501_s3, %s501_s3, %s502_s4  }
  0x18   : > { %p124_p2 = scmp.lt.s32.totalorder %s499_s11, 3 }
  0x1a   : > { %p125_p3 = pnand %p306_p1, %p124_p2 }
  0x1b   : > { %s590_s5 = sand.u32 (!%p125_p3), 1, %s483_s7  }
  0x1c   : > { %128 = sbr.rel (%p125_p3) target bundleno = 82 (0x52), region = 24  ;;  %s307_s12 = sshll.u32 (!%p125_p3), %s590_s5, 3 }
  0x1d   : > { %s131_s13 = scalar_lea.sflag (!%p125_p3), [#allocation3], %s590_s5  ;;  %s134_s15 = scalar_lea.vmem (!%p125_p3), [#allocation2], %s307_s12 }
  0x21   : > { %470 = dma.done.wait (%p563_p8), %s131_s13, 128  }
  0x22   : > { %472 = vsyncadd (%p563_p8), %s131_s13, 4294967168  ;;  %v503_v0 = vmov 4.0   ;;  %vm162_vm0 = vcmask 1041408   ;;  %v154_v2 = vld [vmem:[%s134_s15] sm:$0x3]  ;;  %s315_s16 = sshll.u32 %s491_s9, 3 }
  0x23   : > { %383 = vrcp.f32 %v503_v0  ;;  %v155_v3 = vld [vmem:[%s134_s15 + $0x2] sm:$0x3]  ;;  %v156_v4 = vld [vmem:[%s134_s15 + $0x4] sm:$0x3]  ;;  %v157_v5 = vld [vmem:[%s134_s15 + $0x6] sm:$0x3]  ;;  %v158_v6 = vmul.f32 %v154_v2, %v154_v2  ;;  %s210_s22 = scalar_lea.hbm %s645_s1, %s315_s16 }
  0x24   : > { %v159_v7 = vmul.f32 %v155_v3, %v155_v3  ;;  %v160_v8 = vmul.f32 %v156_v4, %v156_v4  ;;  %v161_v10 = vmul.f32 %v157_v5, %v157_v5  ;;  %s153_s23 = scalar_lea.vmem [#allocation5], %s307_s12  ;;  %s213_s25 = sshll.u32 %s210_s22, 4  ;;  %s214_s25 = int_to_ptr.hbm [resolvable:$true] %s213_s25 }
  0x25   : > { %v163_v11 = vsel %vm162_vm0, %v158_v6, 0.0  ;;  %s211_s24 = sshll.u32 %s153_s23, 4  ;;  %s198_s9 = scalar_lea.sflag [#allocation4], %s590_s5  ;;  %s212_s24 = int_to_ptr.vmem [resolvable:$true] %s211_s24 }
  0x26   : > { %v164_v12 = vsel %vm162_vm0, %v159_v7, 0.0  ;;  %v166_v13 = vsel %vm162_vm0, %v160_v8, 0.0  ;;  %v168_v16 = vsel %vm162_vm0, %v161_v10, 0.0  ;;  %s431_s26 = sshra.s32 %s214_s25, 4  ;;  %s437_s30 = scalar_lea.hbm %s645_s1, 16  ;;  %s432_s26 = int_to_ptr.hbm [resolvable:$true] %s431_s26 }
  0x27   : > { %v165_v15 = vadd.f32 %v164_v12, %v163_v11  ;;  %s433_s27 = scalar_lea.hbm %s432_s26, 8  ;;  %p438_p7 = scmp.lt.s32.totalorder %s432_s26, %s645_s1 }
  0x28   : > { %p434_p4 = scmp.ne.s32.totalorder %s432_s26, %s433_s27  ;;  %p439_p8 = scmp.lt.s32.totalorder %s437_s30, %s433_s27 }
  0x29   : > { %v384_v1 = vpop.eup %383  ;;  %v167_v18 = vadd.f32 %v166_v13, %v165_v15 }
  0x2a   : > { %v171_v9 = vmul.f32 4.0, %v384_v1  ;;  %vm175_vm1 = vweird.f32 %v384_v1  ;;  %p435_p5 = pnand %p434_p4, %p567_p9  ;;  %p440_p10 = por %p439_p8, %p438_p7 }
  0x2b   : > { %v169_v20 = vadd.f32 %v168_v16, %v167_v18 }
  0x2c   : > { %v172_v14 = vsub.f32 1.0, %v171_v9  ;;  %p436_p6 = pneg %p435_p5 }
  0x2e   : > { %v173_v17 = vmul.f32 %v384_v1, %v172_v14  ;;  %p441_p13 = pnand %p440_p10, %p436_p6 }
  0x30   : > { %v174_v19 = vadd.f32 %v384_v1, %v173_v17 }
  0x32   : > { %v176_v21 = vsel %vm175_vm1, %v384_v1, %v174_v19 }
  0x33   : > { %v177_v22 = vmul.f32 %v176_v21, %v169_v20 }
  0x35   : > { %v178_v23 = vadd.f32 1e-08, %v177_v22 }
  0x37   : > { %385 = vrsqrt.f32 %v178_v23  ;;  %vm185_vm2 = vweird.f32 %v178_v23 }
  0x3d   : > { %v386_v24 = vpop.eup %385 }
  0x3e   : > { %v180_v25 = vmul.f32 %v386_v24, %v178_v23  ;;  %vm186_vm3 = vweird.f32 %v386_v24 }
  0x3f   : > { %vm187_vm4 = vmor %vm185_vm2, %vm186_vm3 }
  0x40   : > { %v181_v26 = vmul.f32 %v386_v24, %v180_v25 }
  0x42   : > { %v182_v27 = vmul.f32 0.5, %v181_v26 }
  0x44   : > { %v183_v28 = vsub.f32 1.5, %v182_v27 }
  0x46   : > { %v184_v29 = vmul.f32 %v386_v24, %v183_v28 }
  0x48   : > { %v188_v30 = vsel %vm187_vm4, %v386_v24, %v184_v29 }
  0x49   : > { %v189_v31 = vmul.f32 %v188_v30, %v154_v2  ;;  %v190_v32 = vmul.f32 %v188_v30, %v155_v3  ;;  %v191_v33 = vmul.f32 %v188_v30, %v156_v4  ;;  %v192_v34 = vmul.f32 %v188_v30, %v157_v5 }
  0x4b   : > { %193 = vst [vmem:[%s153_s23] sm:$0x3] %v189_v31 }
  0x4c   : > { %194 = vst [vmem:[%s153_s23 + $0x2] sm:$0x3] %v190_v32 }
  0x4d   : > { %195 = vst [vmem:[%s153_s23 + $0x4] sm:$0x3] %v191_v33 }
  0x4e   : > { %196 = vst [vmem:[%s153_s23 + $0x6] sm:$0x3] %v192_v34 }
  0x4f   : > { %444 = shalt.err (!%p441_p13)
}
  0x50   : > { %s504_s4 = smov 32   ;;  %s505_s5 = smov 2  }
  0x51   : > { %318 = dma.vmem_to_hbm [thread:$0]  (%p567_p9), %s212_s24, 128, %s214_s25, %s198_s9, %s504_s4, %s504_s4, %s505_s5  }
  0x52 PF: > { %s228_s12 = sand.u32 1, %s479_s6   ;;  %p325_p0 = pnand %p302_p12, %p574_p11 }
  0x53   : > { %s229_s13 = scalar_lea.sflag [#allocation4], %s228_s12 }
  0x54   : > { %p326_p1 = pneg %p325_p0 }
  0x56   : > { %474 = dma.done.wait (%p326_p1), %s229_s13, 128  }
  0x57   : > { %476 = vsyncadd (%p326_p1), %s229_s13, 4294967168  ;;  %s17_s11 = sadd.s32 1, %s499_s11   ;;  %s650_s6 = smov %s483_s7 }
  0x58   : > { %p14_p2 = scmp.ge.s32.totalorder %s17_s11, 4   ;;  %s651_s7 = smov %s487_s8 }
  0x59   : > { %s652_s8 = smov %s572_s20  ;;  %s653_s9 = smov %s495_s10 }
  0x5a   : > { %s654_s10 = smov %s656_s14  ;;  %16 = sbr.rel (!%p14_p2) target bundleno = 6 (0x6), region = 69 }
  0x5f   :  { %235 = vsyncpa [#allocation3], 1 }
  0x60   :  { %237 = vsyncpa [#allocation3 + $0x1], 1 }
  0x61   :  { %238 = vsyncpa [#allocation4], 1 }
  0x62   :  { %240 = vsyncpa [#allocation4 + $0x1], 1 }

</bundles_post_ra>
